<compile_context>
chip_gen: v5e
topology: v5e:2x2
jax: 0.10.0
libtpu: 0.0.40
codegen_flags: <defaults>
</compile_context>

<pallas_src>
import jax
import jax.numpy as jnp
from jax.experimental import pallas as pl
from jax.experimental.pallas import tpu as pltpu


# --------------------------------------------------------------------------
# Kernel: one E-tile of distances -> Gaussian basis expansion
# --------------------------------------------------------------------------
def gaussian_smearing_kernel(coeff_ref,   # SMEM [1]      coefficient -0.5/delta^2
                             d_ref,       # VMEM [TE, 1]  distances (tile)
                             offs_ref,    # VMEM [1, G]   gaussian offsets (resident)
                             out_ref):    # VMEM [TE, G]
    diff = d_ref[...] - offs_ref[...]                       # [TE, G] broadcast
    out_ref[...] = jnp.exp(coeff_ref[0] * diff * diff).astype(out_ref.dtype)


# --------------------------------------------------------------------------
# Wrapper
# --------------------------------------------------------------------------
def gaussian_smearing(dist, offset, coeff, *, tile_e=4096, out_dtype=jnp.float32):
    """exp(coeff * (dist.reshape(-1,1) - offset.reshape(1,-1))**2) via Pallas.

    tile_e: rows of the flattened distance axis processed per grid step.
            ~4096 saturates HBM on v5e/v6e; use 8192-16384 on v7x (keep the
            grid length >= 2 there so both TensorCores get work).
    """
    d = jnp.asarray(dist, jnp.float32).reshape(-1, 1)        # [E, 1]
    offs = jnp.asarray(offset, jnp.float32).reshape(1, -1)   # [1, G]
    e, g = d.shape[0], offs.shape[1]

    # Sublane-align E (multiple of 8) -- tiny pad; clamp the tile for small
    # inputs so we never compute whole tiles of padding.
    e_pad = ((e + 7) // 8) * 8
    te = max(8, (min(tile_e, e_pad) // 8) * 8)               # multiple of 8
    if e_pad != e:
        d = jnp.pad(d, ((0, e_pad - e), (0, 0)))

    coeff_arr = jnp.asarray(coeff, jnp.float32).reshape(1)

    out = pl.pallas_call(
        gaussian_smearing_kernel,
        out_shape=jax.ShapeDtypeStruct((e_pad, g), out_dtype),
        grid=(pl.cdiv(e_pad, te),),                          # ragged last tile OK
        in_specs=[
            pl.BlockSpec(memory_space=pltpu.MemorySpace.SMEM),  # coeff (scalar)
            pl.BlockSpec((te, 1), lambda i: (i, 0)),            # distances tile
            pl.BlockSpec((1, g), lambda i: (0, 0)),             # offsets, resident
        ],
        # Output block spans the full (unpadded) Gaussian axis: contiguous
        # whole-row HBM writes, no 50->128 byte inflation, no post-hoc slice.
        out_specs=pl.BlockSpec((te, g), lambda i: (i, 0)),
        compiler_params=pltpu.CompilerParams(
            dimension_semantics=("parallel",)),               # megacore on v7x
    )(coeff_arr, d, offs)

    return out if e == e_pad else out[:e]                    # [E, G]


# --------------------------------------------------------------------------
# Module-style setup (mirrors the torch __init__)
# --------------------------------------------------------------------------
def make_gaussian_smearing_params(start=0.0, stop=5.0, num_gaussians=50):
    offset = jnp.linspace(start, stop, num_gaussians).astype(jnp.float32)
    coeff = -0.5 / float(offset[1] - offset[0]) ** 2
    return offset, coeff


# --------------------------------------------------------------------------
if __name__ == "__main__":
    START, STOP, NUM_GAUSSIANS = 0.0, 5.0, 50
    offset, coeff = make_gaussian_smearing_params(START, STOP, NUM_GAUSSIANS)

    key = jax.random.PRNGKey(0)
    k1, k2 = jax.random.split(key)

    # 1) Small demo matching the module's typical use (dist is flattened).
    dist = jax.random.uniform(k1, (8, 25), jnp.float32, 0.0, STOP)   # 200 distances
    out = jax.block_until_ready(gaussian_smearing(dist, offset, coeff))
    assert out.shape == (dist.size, NUM_GAUSSIANS), out.shape
    assert jnp.all(jnp.isfinite(out))
    ref = jnp.exp(coeff * (dist.reshape(-1, 1) - offset.reshape(1, -1)) ** 2)
    assert jnp.allclose(out, ref, atol=1e-6, rtol=1e-6)

    # 2) Multi-tile + ragged-last-tile path (tile_e override keeps it small).
    dist2 = jax.random.uniform(k2, (3, 700), jnp.float32, 0.0, STOP)  # 2100 distances
    out2 = jax.block_until_ready(gaussian_smearing(dist2, offset, coeff, tile_e=512))
    ref2 = jnp.exp(coeff * (dist2.reshape(-1, 1) - offset.reshape(1, -1)) ** 2)
    assert out2.shape == (dist2.size, NUM_GAUSSIANS), out2.shape
    assert jnp.allclose(out2, ref2, atol=1e-6, rtol=1e-6)

    print("KERNEL_OK")
</pallas_src>

<mosaic_0001>
module attributes {stable_mosaic.version = 11 : i64} {
  func.func @gaussian_smearing_kernel(%arg0: i32, %arg1: memref<1xf32, #tpu.memory_space<smem>>, %arg2: memref<200x1xf32, #tpu.memory_space<vmem>>, %arg3: memref<1x50xf32, #tpu.memory_space<vmem>>, %arg4: memref<200x50xf32, #tpu.memory_space<vmem>>) attributes {dimension_semantics = [#tpu.dimension_semantics<parallel>], iteration_bounds = array<i64: 1>, scalar_prefetch = 0 : i64, scratch_operands = 0 : i64, tpu.core_type = #tpu.core_type<tc>, window_params = [{transform_indices = @transform_0, window_bounds = array<i64: 1>}, {transform_indices = @transform_1, window_bounds = array<i64: 200, 1>}, {pipeline_mode = #tpu.pipeline_mode<synchronous>, transform_indices = @transform_2, window_bounds = array<i64: 1, 50>}, {transform_indices = @transform_3, window_bounds = array<i64: 200, 50>}]} {
    %c0 = arith.constant 0 : index
    %c0_0 = arith.constant 0 : index
    %0 = vector.load %arg2[%c0, %c0_0] : memref<200x1xf32, #tpu.memory_space<vmem>>, vector<200x1xf32>
    %c0_1 = arith.constant 0 : index
    %c0_2 = arith.constant 0 : index
    %1 = vector.load %arg3[%c0_1, %c0_2] : memref<1x50xf32, #tpu.memory_space<vmem>>, vector<1x50xf32>
    %2 = vector.broadcast %0 : vector<200x1xf32> to vector<200x50xf32>
    %3 = vector.broadcast %1 : vector<1x50xf32> to vector<200x50xf32>
    %4 = arith.subf %2, %3 : vector<200x50xf32>
    %c0_3 = arith.constant 0 : index
    %5 = memref.load %arg1[%c0_3] : memref<1xf32, #tpu.memory_space<smem>>
    %6 = vector.broadcast %5 : f32 to vector<200x50xf32>
    %7 = arith.mulf %6, %4 : vector<200x50xf32>
    %8 = arith.mulf %7, %4 : vector<200x50xf32>
    %9 = math.exp %8 : vector<200x50xf32>
    %c0_4 = arith.constant 0 : index
    %c0_5 = arith.constant 0 : index
    %10 = vector.load %arg4[%c0_4, %c0_5] : memref<200x50xf32, #tpu.memory_space<vmem>>, vector<200x50xf32>
    tpu.vector_store %arg4[%c0_4, %c0_5], %9 {strides = array<i32>} : memref<200x50xf32, #tpu.memory_space<vmem>>, vector<200x50xf32>,
    return
  }
  func.func @transform_0(%arg0: i32) -> i32 {
    %c0_i32 = arith.constant 0 : i32
    %c0_i32_0 = arith.constant 0 : i32
    return %c0_i32 : i32
  }
  func.func @transform_1(%arg0: i32) -> (i32, i32) {
    %c0_i32 = arith.constant 0 : i32
    %c0_i32_0 = arith.constant 0 : i32
    return %arg0, %c0_i32 : i32, i32
  }
  func.func @transform_2(%arg0: i32) -> (i32, i32) {
    %c0_i32 = arith.constant 0 : i32
    %c0_i32_0 = arith.constant 0 : i32
    %c0_i32_1 = arith.constant 0 : i32
    return %c0_i32, %c0_i32_0 : i32, i32
  }
  func.func @transform_3(%arg0: i32) -> (i32, i32) {
    %c0_i32 = arith.constant 0 : i32
    %c0_i32_0 = arith.constant 0 : i32
    return %arg0, %c0_i32 : i32, i32
  }
}

</mosaic_0001>

<bundles_post_ra>
// kernel: tpu_custom_call.1
= control target key start
LH: loop header
LB: loop body
LE: loop exit
PB: predicated region body
PF: predicated region fallthrough
CT: control target
= control target key end

     0   :  { %v381_v0 = vmov 0   ;;  %vm296_vm0 = vcmask 408576   ;;  %s637_s1 = inlined_call_operand.vmem [shape: f32[200,1], index: 1, kind: input, shape index: {}]   ;;  %s638_s2 = inlined_call_operand.vmem [shape: f32[1,50], index: 2, kind: input, shape index: {}]   ;;  %s639_s0 = inlined_call_operand.<no memory space> [shape: f32[1], index: 0, kind: input, shape index: {}]   ;;  %s640_s3 = inlined_call_operand.vmem [shape: f32[200,50], index: 3, kind: output, shape index: {}]  }
   0x1   :  { %329 = vset.pattern.permute.xlu2 %v381_v0  ;;  %328 = vset.pattern.permute.xlu1 %v381_v0  ;;  %v19_v1 = vld [vmem:[%s637_s1 + $0x20] sm:$0xff]  ;;  %v17_v2 = vld [vmem:[%s637_s1 + $0x10] sm:$0xff]  ;;  %v20_v4 = vld [vmem:[%s637_s1 + $0x28] sm:$0xff]  ;;  %v486_v29 = vstv %s639_s0 }
   0x2   :  { %v15_v3 = vld [vmem:[%s637_s1] sm:$0xff]  ;;  %327 = vset.pattern.permute.xlu0 %v381_v0  ;;  %63 = vperm.xlu2 %329, %v19_v1   ;;  %v18_v5 = vld [vmem:[%s637_s1 + $0x18] sm:$0xff]  ;;  %v16_v6 = vld [vmem:[%s637_s1 + $0x8] sm:$0xff] }
   0x3   :  { %53 = vperm.xlu1 %328, %v17_v2   ;;  %43 = vperm.xlu0 %327, %v15_v3   ;;  %v23_v7 = vld [vmem:[%s637_s1 + $0x40] sm:$0xff]  ;;  %v22_v8 = vld [vmem:[%s637_s1 + $0x38] sm:$0xff]  ;;  %v21_v9 = vld [vmem:[%s637_s1 + $0x30] sm:$0xff] }
   0x4   :  { %v26_v10 = vld [vmem:[%s637_s1 + $0x58] sm:$0xff]  ;;  %v25_v11 = vld [vmem:[%s637_s1 + $0x50] sm:$0xff]  ;;  %v24_v12 = vld [vmem:[%s637_s1 + $0x48] sm:$0xff] }
   0x5   :  { %v29_v13 = vld [vmem:[%s637_s1 + $0x70] sm:$0xff]  ;;  %v28_v14 = vld [vmem:[%s637_s1 + $0x68] sm:$0xff]  ;;  %v27_v15 = vld [vmem:[%s637_s1 + $0x60] sm:$0xff] }
   0x6   :  { %v32_v16 = vld [vmem:[%s637_s1 + $0x88] sm:$0xff]  ;;  %v31_v17 = vld [vmem:[%s637_s1 + $0x80] sm:$0xff]  ;;  %v30_v18 = vld [vmem:[%s637_s1 + $0x78] sm:$0xff] }
   0x7   :  { %v35_v19 = vld [vmem:[%s637_s1 + $0xa0] sm:$0xff]  ;;  %v34_v20 = vld [vmem:[%s637_s1 + $0x98] sm:$0xff]  ;;  %v33_v21 = vld [vmem:[%s637_s1 + $0x90] sm:$0xff] }
   0x8   :  { %v38_v22 = vld [vmem:[%s637_s1 + $0xb8] sm:$0xff]  ;;  %v37_v23 = vld [vmem:[%s637_s1 + $0xb0] sm:$0xff]  ;;  %v36_v24 = vld [vmem:[%s637_s1 + $0xa8] sm:$0xff] }
   0x9   :  { %v39_v25 = vld [vmem:[%s637_s1 + $0xc0] sm:$0xff] }
   0xa   :  { %68 = vperm.xlu2 %329, %v20_v4   ;;  %v480_v26 = vld [vmem:[%s638_s2] ss:$0 sm:$0xff] }
   0xb   :  { %58 = vperm.xlu1 %328, %v18_v5   ;;  %48 = vperm.xlu0 %327, %v16_v6  }
  0x12   :  { %83 = vperm.xlu2 %329, %v23_v7  }
  0x13   :  { %78 = vperm.xlu1 %328, %v22_v8   ;;  %73 = vperm.xlu0 %327, %v21_v9  }
  0x1a   :  { %98 = vperm.xlu2 %329, %v26_v10  }
  0x1b   :  { %93 = vperm.xlu1 %328, %v25_v11   ;;  %88 = vperm.xlu0 %327, %v24_v12  }
  0x22   :  { %113 = vperm.xlu2 %329, %v29_v13  }
  0x23   :  { %108 = vperm.xlu1 %328, %v28_v14   ;;  %103 = vperm.xlu0 %327, %v27_v15  }
  0x2a   :  { %128 = vperm.xlu2 %329, %v32_v16  }
  0x2b   :  { %123 = vperm.xlu1 %328, %v31_v17   ;;  %118 = vperm.xlu0 %327, %v30_v18  }
  0x32   :  { %143 = vperm.xlu2 %329, %v35_v19  }
  0x33   :  { %138 = vperm.xlu1 %328, %v34_v20   ;;  %133 = vperm.xlu0 %327, %v33_v21  }
  0x3a   :  { %158 = vperm.xlu2 %329, %v38_v22  }
  0x3b   :  { %153 = vperm.xlu1 %328, %v37_v23   ;;  %148 = vperm.xlu0 %327, %v36_v24  }
  0x43   :  { %163 = vperm.xlu0 %327, %v39_v25  }
  0x5c   :  { %v64_v27 = vpop.permute.xlu2 %63 }
  0x5d   :  { %v173_v28 = vsub.f32 %v64_v27, %v480_v26 }
  0x5f   :  { %v200_v30 = vmul.f32 %v486_v29, %v173_v28 }
  0x61   :  { %v225_v31 = vmul.f32 %v200_v30, %v173_v28 }
  0x63   :  { %v254_v32 = vmul.f32 1.442695, %v225_v31 }
  0x64   :  { %v69_v33 = vpop.permute.xlu2 %68 }
  0x65   :  { %331 = vpow2.f32 %v254_v32  ;;  %v174_v34 = vsub.f32 %v69_v33, %v480_v26 }
  0x67   :  { %v201_v35 = vmul.f32 %v486_v29, %v174_v34 }
  0x69   :  { %v226_v36 = vmul.f32 %v201_v35, %v174_v34 }
  0x6b   :  { %v332_v37 = vpop.eup %331  ;;  %v256_v38 = vmul.f32 1.442695, %v226_v36 }
  0x6c   :  { %301 = vst.msk [vmem:[%s640_s3 + $0x20] sm:$0xff] %vm296_vm0, %v332_v37  ;;  %v84_v39 = vpop.permute.xlu2 %83 }
  0x6d   :  { %333 = vpow2.f32 %v256_v38  ;;  %v177_v40 = vsub.f32 %v84_v39, %v480_v26 }
  0x6f   :  { %v204_v41 = vmul.f32 %v486_v29, %v177_v40 }
  0x71   :  { %v229_v42 = vmul.f32 %v204_v41, %v177_v40 }
  0x73   :  { %v334_v43 = vpop.eup %333  ;;  %v262_v44 = vmul.f32 1.442695, %v229_v42 }
  0x74   :  { %302 = vst.msk [vmem:[%s640_s3 + $0x28] sm:$0xff] %vm296_vm0, %v334_v43  ;;  %v99_v45 = vpop.permute.xlu2 %98 }
  0x75   :  { %335 = vpow2.f32 %v262_v44  ;;  %v180_v46 = vsub.f32 %v99_v45, %v480_v26  ;;  %v54_v47 = vpop.permute.xlu1 %53  ;;  %v44_v48 = vpop.permute.xlu0 %43 }
  0x76   :  { %v171_v49 = vsub.f32 %v54_v47, %v480_v26  ;;  %v169_v50 = vsub.f32 %v44_v48, %v480_v26 }
  0x77   :  { %v207_v51 = vmul.f32 %v486_v29, %v180_v46 }
  0x78   :  { %v198_v52 = vmul.f32 %v486_v29, %v171_v49  ;;  %v196_v53 = vmul.f32 %v486_v29, %v169_v50 }
  0x79   :  { %v232_v54 = vmul.f32 %v207_v51, %v180_v46 }
  0x7a   :  { %v223_v55 = vmul.f32 %v198_v52, %v171_v49  ;;  %v221_v56 = vmul.f32 %v196_v53, %v169_v50 }
  0x7b   :  { %v336_v57 = vpop.eup %335  ;;  %v268_v58 = vmul.f32 1.442695, %v232_v54 }
  0x7c   :  { %305 = vst.msk [vmem:[%s640_s3 + $0x40] sm:$0xff] %vm296_vm0, %v336_v57  ;;  %v250_v59 = vmul.f32 1.442695, %v223_v55  ;;  %v246_v60 = vmul.f32 1.442695, %v221_v56  ;;  %v114_v61 = vpop.permute.xlu2 %113 }
  0x7d   :  { %337 = vpow2.f32 %v268_v58  ;;  %v183_v62 = vsub.f32 %v114_v61, %v480_v26  ;;  %v59_v63 = vpop.permute.xlu1 %58  ;;  %v49_v0 = vpop.permute.xlu0 %48 }
  0x7e   :  { %339 = vpow2.f32 %v250_v59  ;;  %v172_v1 = vsub.f32 %v59_v63, %v480_v26  ;;  %v170_v2 = vsub.f32 %v49_v0, %v480_v26 }
  0x7f   :  { %341 = vpow2.f32 %v246_v60  ;;  %v210_v3 = vmul.f32 %v486_v29, %v183_v62 }
  0x80   :  { %v199_v4 = vmul.f32 %v486_v29, %v172_v1  ;;  %v197_v5 = vmul.f32 %v486_v29, %v170_v2 }
  0x81   :  { %v235_v6 = vmul.f32 %v210_v3, %v183_v62 }
  0x82   :  { %v224_v7 = vmul.f32 %v199_v4, %v172_v1  ;;  %v222_v8 = vmul.f32 %v197_v5, %v170_v2 }
  0x83   :  { %v338_v9 = vpop.eup %337  ;;  %v274_v10 = vmul.f32 1.442695, %v235_v6 }
  0x84   :  { %v340_v11 = vpop.eup %339  ;;  %308 = vst.msk [vmem:[%s640_s3 + $0x58] sm:$0xff] %vm296_vm0, %v338_v9  ;;  %v252_v12 = vmul.f32 1.442695, %v224_v7  ;;  %v248_v13 = vmul.f32 1.442695, %v222_v8  ;;  %v129_v14 = vpop.permute.xlu2 %128 }
  0x85   :  { %v342_v15 = vpop.eup %341  ;;  %299 = vst.msk [vmem:[%s640_s3 + $0x10] sm:$0xff] %vm296_vm0, %v340_v11  ;;  %343 = vpow2.f32 %v274_v10  ;;  %v186_v16 = vsub.f32 %v129_v14, %v480_v26  ;;  %v79_v17 = vpop.permute.xlu1 %78 }
  0x86   :  { %v74_v18 = vpop.permute.xlu0 %73  ;;  %297 = vst.msk [vmem:[%s640_s3] sm:$0xff] %vm296_vm0, %v342_v15  ;;  %345 = vpow2.f32 %v252_v12  ;;  %v176_v19 = vsub.f32 %v79_v17, %v480_v26 }
  0x87   :  { %v175_v20 = vsub.f32 %v74_v18, %v480_v26  ;;  %347 = vpow2.f32 %v248_v13  ;;  %v213_v21 = vmul.f32 %v486_v29, %v186_v16 }
  0x88   :  { %v203_v22 = vmul.f32 %v486_v29, %v176_v19 }
  0x89   :  { %v202_v23 = vmul.f32 %v486_v29, %v175_v20  ;;  %v238_v24 = vmul.f32 %v213_v21, %v186_v16 }
  0x8a   :  { %v228_v25 = vmul.f32 %v203_v22, %v176_v19 }
  0x8b   :  { %v227_v27 = vmul.f32 %v202_v23, %v175_v20  ;;  %v344_v28 = vpop.eup %343  ;;  %v280_v30 = vmul.f32 1.442695, %v238_v24 }
  0x8c   :  { %v346_v31 = vpop.eup %345  ;;  %311 = vst.msk [vmem:[%s640_s3 + $0x70] sm:$0xff] %vm296_vm0, %v344_v28  ;;  %v260_v32 = vmul.f32 1.442695, %v228_v25  ;;  %v144_v34 = vpop.permute.xlu2 %143 }
  0x8d   :  { %v258_v33 = vmul.f32 1.442695, %v227_v27  ;;  %v348_v35 = vpop.eup %347  ;;  %300 = vst.msk [vmem:[%s640_s3 + $0x18] sm:$0xff] %vm296_vm0, %v346_v31  ;;  %349 = vpow2.f32 %v280_v30  ;;  %v189_v36 = vsub.f32 %v144_v34, %v480_v26  ;;  %v94_v37 = vpop.permute.xlu1 %93 }
  0x8e   :  { %v89_v38 = vpop.permute.xlu0 %88  ;;  %298 = vst.msk [vmem:[%s640_s3 + $0x8] sm:$0xff] %vm296_vm0, %v348_v35  ;;  %351 = vpow2.f32 %v260_v32  ;;  %v179_v39 = vsub.f32 %v94_v37, %v480_v26 }
  0x8f   :  { %v178_v40 = vsub.f32 %v89_v38, %v480_v26  ;;  %353 = vpow2.f32 %v258_v33  ;;  %v216_v41 = vmul.f32 %v486_v29, %v189_v36 }
  0x90   :  { %v206_v42 = vmul.f32 %v486_v29, %v179_v39 }
  0x91   :  { %v205_v43 = vmul.f32 %v486_v29, %v178_v40  ;;  %v241_v44 = vmul.f32 %v216_v41, %v189_v36 }
  0x92   :  { %v231_v45 = vmul.f32 %v206_v42, %v179_v39 }
  0x93   :  { %v230_v46 = vmul.f32 %v205_v43, %v178_v40  ;;  %v350_v47 = vpop.eup %349  ;;  %v286_v48 = vmul.f32 1.442695, %v241_v44 }
  0x94   :  { %v352_v49 = vpop.eup %351  ;;  %314 = vst.msk [vmem:[%s640_s3 + $0x88] sm:$0xff] %vm296_vm0, %v350_v47  ;;  %v266_v50 = vmul.f32 1.442695, %v231_v45  ;;  %v159_v52 = vpop.permute.xlu2 %158 }
  0x95   :  { %v264_v51 = vmul.f32 1.442695, %v230_v46  ;;  %v354_v53 = vpop.eup %353  ;;  %304 = vst.msk [vmem:[%s640_s3 + $0x38] sm:$0xff] %vm296_vm0, %v352_v49  ;;  %355 = vpow2.f32 %v286_v48  ;;  %v192_v54 = vsub.f32 %v159_v52, %v480_v26  ;;  %v109_v55 = vpop.permute.xlu1 %108 }
  0x96   :  { %v104_v56 = vpop.permute.xlu0 %103  ;;  %303 = vst.msk [vmem:[%s640_s3 + $0x30] sm:$0xff] %vm296_vm0, %v354_v53  ;;  %357 = vpow2.f32 %v266_v50  ;;  %v182_v57 = vsub.f32 %v109_v55, %v480_v26 }
  0x97   :  { %v181_v58 = vsub.f32 %v104_v56, %v480_v26  ;;  %359 = vpow2.f32 %v264_v51  ;;  %v219_v59 = vmul.f32 %v486_v29, %v192_v54 }
  0x98   :  { %v209_v60 = vmul.f32 %v486_v29, %v182_v57 }
  0x99   :  { %v208_v61 = vmul.f32 %v486_v29, %v181_v58  ;;  %v244_v62 = vmul.f32 %v219_v59, %v192_v54 }
  0x9a   :  { %v234_v63 = vmul.f32 %v209_v60, %v182_v57 }
  0x9b   :  { %v233_v0 = vmul.f32 %v208_v61, %v181_v58  ;;  %v356_v1 = vpop.eup %355  ;;  %v292_v2 = vmul.f32 1.442695, %v244_v62 }
  0x9c   :  { %v358_v3 = vpop.eup %357  ;;  %317 = vst.msk [vmem:[%s640_s3 + $0xa0] sm:$0xff] %vm296_vm0, %v356_v1  ;;  %v272_v4 = vmul.f32 1.442695, %v234_v63 }
  0x9d   :  { %v270_v5 = vmul.f32 1.442695, %v233_v0  ;;  %v360_v6 = vpop.eup %359  ;;  %307 = vst.msk [vmem:[%s640_s3 + $0x50] sm:$0xff] %vm296_vm0, %v358_v3  ;;  %361 = vpow2.f32 %v292_v2  ;;  %v124_v7 = vpop.permute.xlu1 %123 }
  0x9e   :  { %v119_v8 = vpop.permute.xlu0 %118  ;;  %306 = vst.msk [vmem:[%s640_s3 + $0x48] sm:$0xff] %vm296_vm0, %v360_v6  ;;  %363 = vpow2.f32 %v272_v4  ;;  %v185_v9 = vsub.f32 %v124_v7, %v480_v26 }
  0x9f   :  { %v184_v10 = vsub.f32 %v119_v8, %v480_v26  ;;  %365 = vpow2.f32 %v270_v5 }
  0xa0   :  { %v212_v11 = vmul.f32 %v486_v29, %v185_v9 }
  0xa1   :  { %v211_v12 = vmul.f32 %v486_v29, %v184_v10 }
  0xa2   :  { %v237_v13 = vmul.f32 %v212_v11, %v185_v9 }
  0xa3   :  { %v236_v14 = vmul.f32 %v211_v12, %v184_v10  ;;  %v362_v15 = vpop.eup %361 }
  0xa4   :  { %v364_v16 = vpop.eup %363  ;;  %320 = vst.msk [vmem:[%s640_s3 + $0xb8] sm:$0xff] %vm296_vm0, %v362_v15  ;;  %v278_v17 = vmul.f32 1.442695, %v237_v13 }
  0xa5   :  { %v276_v18 = vmul.f32 1.442695, %v236_v14  ;;  %v366_v19 = vpop.eup %365  ;;  %310 = vst.msk [vmem:[%s640_s3 + $0x68] sm:$0xff] %vm296_vm0, %v364_v16  ;;  %v139_v20 = vpop.permute.xlu1 %138 }
  0xa6   :  { %v134_v21 = vpop.permute.xlu0 %133  ;;  %309 = vst.msk [vmem:[%s640_s3 + $0x60] sm:$0xff] %vm296_vm0, %v366_v19  ;;  %367 = vpow2.f32 %v278_v17  ;;  %v188_v22 = vsub.f32 %v139_v20, %v480_v26 }
  0xa7   :  { %v187_v23 = vsub.f32 %v134_v21, %v480_v26  ;;  %369 = vpow2.f32 %v276_v18 }
  0xa8   :  { %v215_v24 = vmul.f32 %v486_v29, %v188_v22 }
  0xa9   :  { %v214_v25 = vmul.f32 %v486_v29, %v187_v23 }
  0xaa   :  { %v240_v27 = vmul.f32 %v215_v24, %v188_v22 }
  0xab   :  { %v239_v28 = vmul.f32 %v214_v25, %v187_v23 }
  0xac   :  { %v368_v30 = vpop.eup %367  ;;  %v284_v31 = vmul.f32 1.442695, %v240_v27 }
  0xad   :  { %v282_v32 = vmul.f32 1.442695, %v239_v28  ;;  %v370_v33 = vpop.eup %369  ;;  %313 = vst.msk [vmem:[%s640_s3 + $0x80] sm:$0xff] %vm296_vm0, %v368_v30  ;;  %v154_v34 = vpop.permute.xlu1 %153 }
  0xae   :  { %v149_v35 = vpop.permute.xlu0 %148  ;;  %312 = vst.msk [vmem:[%s640_s3 + $0x78] sm:$0xff] %vm296_vm0, %v370_v33  ;;  %371 = vpow2.f32 %v284_v31  ;;  %v191_v36 = vsub.f32 %v154_v34, %v480_v26 }
  0xaf   :  { %v190_v37 = vsub.f32 %v149_v35, %v480_v26  ;;  %373 = vpow2.f32 %v282_v32 }
  0xb0   :  { %v218_v38 = vmul.f32 %v486_v29, %v191_v36 }
  0xb1   :  { %v217_v39 = vmul.f32 %v486_v29, %v190_v37 }
  0xb2   :  { %v243_v40 = vmul.f32 %v218_v38, %v191_v36 }
  0xb3   :  { %v242_v41 = vmul.f32 %v217_v39, %v190_v37 }
  0xb4   :  { %v372_v42 = vpop.eup %371  ;;  %v290_v43 = vmul.f32 1.442695, %v243_v40 }
  0xb5   :  { %v288_v44 = vmul.f32 1.442695, %v242_v41  ;;  %v374_v45 = vpop.eup %373  ;;  %316 = vst.msk [vmem:[%s640_s3 + $0x98] sm:$0xff] %vm296_vm0, %v372_v42 }
  0xb6   :  { %v164_v46 = vpop.permute.xlu0 %163  ;;  %315 = vst.msk [vmem:[%s640_s3 + $0x90] sm:$0xff] %vm296_vm0, %v374_v45  ;;  %375 = vpow2.f32 %v290_v43 }
  0xb7   :  { %v193_v47 = vsub.f32 %v164_v46, %v480_v26  ;;  %377 = vpow2.f32 %v288_v44 }
  0xb9   :  { %v220_v48 = vmul.f32 %v486_v29, %v193_v47 }
  0xbb   :  { %v245_v49 = vmul.f32 %v220_v48, %v193_v47 }
  0xbc   :  { %v376_v50 = vpop.eup %375 }
  0xbd   :  { %v294_v51 = vmul.f32 1.442695, %v245_v49  ;;  %v378_v52 = vpop.eup %377  ;;  %319 = vst.msk [vmem:[%s640_s3 + $0xb0] sm:$0xff] %vm296_vm0, %v376_v50 }
  0xbe   :  { %318 = vst.msk [vmem:[%s640_s3 + $0xa8] sm:$0xff] %vm296_vm0, %v378_v52 }
  0xbf   :  { %379 = vpow2.f32 %v294_v51 }
  0xc5   :  { %v380_v53 = vpop.eup %379 }
  0xc6   :  { %321 = vst.msk [vmem:[%s640_s3 + $0xc0] sm:$0xff] %vm296_vm0, %v380_v53 }

</bundles_post_ra>
